<compile_context>
chip_gen: v7x
topology: tpu7x:2x2x1
jax: 0.10.0
libtpu: 0.0.40
codegen_flags: <defaults>
</compile_context>

<pallas_src>
import jax
import jax.numpy as jnp
from jax.experimental import pallas as pl
from jax.experimental.pallas import tpu as pltpu

FILTERS = 32          # number of capsule Conv1d modules
PRIMARY_CAPSLEN = 8   # out_channels of each Conv1d (capsule length)
KS = 5                # kernel size
STRIDE = 2
C_IN = 32             # in_channels of each Conv1d
K_DIM = C_IN * KS             # 160 (im2col contraction dim)
F8 = FILTERS * PRIMARY_CAPSLEN  # 256 (output lanes; col = o*32 + f)


def _convcaps_kernel(p_ref, w_ref, b_ref, o_ref):
    # p_ref: (TM, K)   bf16 im2col patches tile (rows = flattened b*L_out + p)
    # w_ref: (K, 256)  bf16 fused conv weights, column index = o*32 + f
    # b_ref: (1, 256)  f32 fused biases, same column order
    # o_ref: (TM, 256) f32 squashed capsule outputs
    y = jnp.dot(p_ref[...], w_ref[...],
                preferred_element_type=jnp.float32)          # MXU, f32 acc
    y = y + b_ref[...]                                       # bias add (f32)

    # Per-capsule squared norm.  Capsule f's 8 components live at lanes
    # {f, f+32, ..., f+224}; summing all cyclic shifts by multiples of 32
    # (tree: 32, 64, 128) puts each capsule's norm in every one of its lanes.
    s = y * y
    s = s + pltpu.roll(s, 32, axis=1)
    s = s + pltpu.roll(s, 64, axis=1)
    s = s + pltpu.roll(s, 128, axis=1)

    # squash: (norm/(1+norm)) * y / sqrt(norm) == y * sqrt(norm) / (1+norm)
    o_ref[...] = y * jnp.sqrt(s) * pl.reciprocal(1.0 + s, approx=True)


def convcaps2d_forward(x, weights, biases, *, tm=256):
    """x: (B, C_IN, L) f32; weights: (FILTERS, 8, C_IN, KS); biases: (FILTERS, 8).
    Returns (B, FILTERS*L_out, PRIMARY_CAPSLEN), matching the PyTorch module."""
    B, C, L = x.shape
    L_out = (L - KS) // STRIDE + 1
    M = B * L_out

    # --- glue: im2col  patches[b*L_out+p, c*KS+k] = x[b, c, p*STRIDE + k]
    pos = jnp.arange(L_out) * STRIDE
    idx = pos[:, None] + jnp.arange(KS)[None, :]              # (L_out, KS)
    patches = x[:, :, idx]                                    # (B, C, L_out, KS)
    patches = jnp.transpose(patches, (0, 2, 1, 3)).reshape(M, K_DIM)
    patches = patches.astype(jnp.bfloat16)

    # --- tile the flattened M axis (multiple of 8 sublanes, capped for VMEM)
    TM = min(tm, max(8, ((M + 7) // 8) * 8))
    M_pad = ((M + TM - 1) // TM) * TM
    if M_pad != M:
        patches = jnp.pad(patches, ((0, M_pad - M), (0, 0)))

    # --- glue: fuse weights with column order o*32 + f
    #     w_mat[c*KS+k, o*32+f] = weights[f, o, c, k]
    w_mat = jnp.transpose(weights, (2, 3, 1, 0)).reshape(K_DIM, F8)
    w_mat = w_mat.astype(jnp.bfloat16)
    b_vec = jnp.transpose(biases, (1, 0)).reshape(1, F8).astype(jnp.float32)

    out = pl.pallas_call(
        _convcaps_kernel,
        out_shape=jax.ShapeDtypeStruct((M_pad, F8), jnp.float32),
        grid_spec=pltpu.PrefetchScalarGridSpec(
            num_scalar_prefetch=0,
            grid=(M_pad // TM,),
            in_specs=[
                pl.BlockSpec((TM, K_DIM), lambda i: (i, 0)),
                pl.BlockSpec((K_DIM, F8), lambda i: (0, 0)),  # VMEM-resident
                pl.BlockSpec((1, F8), lambda i: (0, 0)),      # VMEM-resident
            ],
            out_specs=pl.BlockSpec((TM, F8), lambda i: (i, 0)),
        ),
        compiler_params=pltpu.CompilerParams(
            dimension_semantics=("parallel",)),
    )(patches, w_mat, b_vec)

    # --- glue: undo column order & match PyTorch cat(dim=2).permute(0,2,1)
    out = out[:M].reshape(B, L_out, PRIMARY_CAPSLEN, FILTERS)   # (b, p, o, f)
    out = jnp.transpose(out, (0, 3, 1, 2))                      # (b, f, p, o)
    return out.reshape(B, FILTERS * L_out, PRIMARY_CAPSLEN)


def _reference(x, weights, biases):
    """Pure-JAX reference mirroring the PyTorch forward (f32, HIGHEST)."""
    B = x.shape[0]
    outs = []
    for f in range(FILTERS):
        y = jax.lax.conv_general_dilated(
            x, weights[f], window_strides=(STRIDE,), padding="VALID",
            dimension_numbers=("NCH", "OIH", "NCH"),
            precision=jax.lax.Precision.HIGHEST)
        y = y + biases[f][None, :, None]
        outs.append(y.reshape(B, PRIMARY_CAPSLEN, -1))
    out = jnp.concatenate(outs, axis=2)
    out = jnp.transpose(out, (0, 2, 1))
    norm = jnp.sum(out * out, axis=-1, keepdims=True)
    scale = norm / (1.0 + norm)
    return scale * out / jnp.sqrt(norm)


if __name__ == "__main__":
    key = jax.random.PRNGKey(0)
    k1, k2, k3 = jax.random.split(key, 3)

    B, L = 2, 16                                   # small test shapes
    x = jax.random.normal(k1, (B, C_IN, L), jnp.float32)

    # Deterministic param init (uniform(-1/sqrt(fan_in), 1/sqrt(fan_in)),
    # same shapes as nn.Conv1d in the module).
    fan_in = C_IN * KS
    bound = float(fan_in) ** -0.5
    weights = jax.random.uniform(k2, (FILTERS, PRIMARY_CAPSLEN, C_IN, KS),
                                 jnp.float32, -bound, bound)
    biases = jax.random.uniform(k3, (FILTERS, PRIMARY_CAPSLEN),
                                jnp.float32, -bound, bound)

    out = convcaps2d_forward(x, weights, biases)
    jax.block_until_ready(out)

    ref = _reference(x, weights, biases)
    assert out.shape == ref.shape, (out.shape, ref.shape)
    assert bool(jnp.allclose(out, ref, rtol=1e-2, atol=1e-2)), \
        float(jnp.max(jnp.abs(out - ref)))
    print("KERNEL_OK")
</pallas_src>

<mosaic_0001>
module attributes {stable_mosaic.version = 11 : i64} {
  func.func @_convcaps_kernel(%arg0: i32, %arg1: memref<16x160xbf16, #tpu.memory_space<vmem>>, %arg2: memref<160x256xbf16, #tpu.memory_space<vmem>>, %arg3: memref<1x256xf32, #tpu.memory_space<vmem>>, %arg4: memref<16x256xf32, #tpu.memory_space<vmem>>) attributes {dimension_semantics = [#tpu.dimension_semantics<parallel>], iteration_bounds = array<i64: 1>, scalar_prefetch = 0 : i64, scratch_operands = 0 : i64, tpu.core_type = #tpu.core_type<tc>, window_params = [{transform_indices = @transform_0, window_bounds = array<i64: 16, 160>}, {pipeline_mode = #tpu.pipeline_mode<synchronous>, transform_indices = @transform_1, window_bounds = array<i64: 160, 256>}, {pipeline_mode = #tpu.pipeline_mode<synchronous>, transform_indices = @transform_2, window_bounds = array<i64: 1, 256>}, {transform_indices = @transform_3, window_bounds = array<i64: 16, 256>}]} {
    %c0 = arith.constant 0 : index
    %c0_0 = arith.constant 0 : index
    %0 = vector.load %arg1[%c0, %c0_0] : memref<16x160xbf16, #tpu.memory_space<vmem>>, vector<16x160xbf16>
    %c0_1 = arith.constant 0 : index
    %c0_2 = arith.constant 0 : index
    %1 = vector.load %arg2[%c0_1, %c0_2] : memref<160x256xbf16, #tpu.memory_space<vmem>>, vector<160x256xbf16>
    %cst = arith.constant dense<0.000000e+00> : vector<16x256xf32>
    %2 = tpu.matmul %0, %1, %cst {dimension_numbers = #tpu.dot_dimension_numbers<[1], [0], [0], [1], [0, 0, 1, 1], [], []>} : vector<16x160xbf16>, vector<160x256xbf16>, vector<16x256xf32> -> vector<16x256xf32>
    %c0_3 = arith.constant 0 : index
    %c0_4 = arith.constant 0 : index
    %3 = vector.load %arg3[%c0_3, %c0_4] : memref<1x256xf32, #tpu.memory_space<vmem>>, vector<1x256xf32>
    %4 = vector.broadcast %3 : vector<1x256xf32> to vector<16x256xf32>
    %5 = arith.addf %2, %4 : vector<16x256xf32>
    %6 = arith.mulf %5, %5 : vector<16x256xf32>
    %c32_i32 = arith.constant 32 : i32
    %7 = tpu.dynamic_rotate %6 by %c32_i32 dim 1 : vector<16x256xf32>, i32 -> vector<16x256xf32>
    %8 = arith.addf %6, %7 : vector<16x256xf32>
    %c64_i32 = arith.constant 64 : i32
    %9 = tpu.dynamic_rotate %8 by %c64_i32 dim 1 : vector<16x256xf32>, i32 -> vector<16x256xf32>
    %10 = arith.addf %8, %9 : vector<16x256xf32>
    %c128_i32 = arith.constant 128 : i32
    %11 = tpu.dynamic_rotate %10 by %c128_i32 dim 1 : vector<16x256xf32>, i32 -> vector<16x256xf32>
    %12 = arith.addf %10, %11 : vector<16x256xf32>
    %13 = math.sqrt %12 : vector<16x256xf32>
    %14 = arith.mulf %5, %13 : vector<16x256xf32>
    %cst_5 = arith.constant 1.000000e+00 : f32
    %15 = vector.broadcast %cst_5 : f32 to vector<16x256xf32>
    %16 = arith.addf %15, %12 : vector<16x256xf32>
    %17 = tpu.reciprocal %16 {approx = true} : vector<16x256xf32> -> vector<16x256xf32>
    %18 = arith.mulf %14, %17 : vector<16x256xf32>
    %c0_6 = arith.constant 0 : index
    %c0_7 = arith.constant 0 : index
    %19 = vector.load %arg4[%c0_6, %c0_7] : memref<16x256xf32, #tpu.memory_space<vmem>>, vector<16x256xf32>
    tpu.vector_store %arg4[%c0_6, %c0_7], %18 {strides = array<i32>} : memref<16x256xf32, #tpu.memory_space<vmem>>, vector<16x256xf32>,
    return
  }
  func.func @transform_0(%arg0: i32) -> (i32, i32) {
    %c0_i32 = arith.constant 0 : i32
    %c0_i32_0 = arith.constant 0 : i32
    return %arg0, %c0_i32 : i32, i32
  }
  func.func @transform_1(%arg0: i32) -> (i32, i32) {
    %c0_i32 = arith.constant 0 : i32
    %c0_i32_0 = arith.constant 0 : i32
    %c0_i32_1 = arith.constant 0 : i32
    return %c0_i32, %c0_i32_0 : i32, i32
  }
  func.func @transform_2(%arg0: i32) -> (i32, i32) {
    %c0_i32 = arith.constant 0 : i32
    %c0_i32_0 = arith.constant 0 : i32
    %c0_i32_1 = arith.constant 0 : i32
    return %c0_i32, %c0_i32_0 : i32, i32
  }
  func.func @transform_3(%arg0: i32) -> (i32, i32) {
    %c0_i32 = arith.constant 0 : i32
    %c0_i32_0 = arith.constant 0 : i32
    return %arg0, %c0_i32 : i32, i32
  }
}

</mosaic_0001>

<bundles_post_ra>
// kernel: tpu_custom_call.1
= control target key start
LH: loop header
LB: loop body
LE: loop exit
PB: predicated region body
PF: predicated region fallthrough
CT: control target
= control target key end

     0   :  { %8 = vsyncpa [#allocation3], 0  ;;  %s557_s0 = inlined_call_operand.hbm [shape: bf16[16,160], index: 0, kind: input, shape index: {}]   ;;  %s558_s1 = inlined_call_operand.hbm [shape: bf16[160,256], index: 1, kind: input, shape index: {}]   ;;  %s559_s2 = inlined_call_operand.vmem [shape: f32[1,256], index: 2, kind: input, shape index: {}]   ;;  %s560_s3 = inlined_call_operand.hbm [shape: f32[16,256], index: 3, kind: output, shape index: {}]  }
   0x1   :  { %9 = vsyncpa [#allocation6], 0 }
   0x2   :  { %10 = vsyncpa [#allocation4], 0  ;;  %s469_s12 = smov [#allocation2]   ;;  %s397_s16 = scalar_lea.hbm %s557_s0, 256 }
   0x3   :  { %s16_s13 = sshll.u32 %s469_s12, 4  ;;  %p398_p0 = scmp.ne.s32.totalorder %s557_s0, %s397_s16  ;;  %s17_s13 = int_to_ptr.vmem [resolvable:$true] %s16_s13 }
   0x4   :  { %p401_p1 = scmp.lt.u32.totalorder %s397_s16, %s557_s0 }
   0x6   :  { %p403_p2 = pnand %p401_p1, %p398_p0 }
   0x8   :  { %406 = shalt.err (!%p403_p2)
}
   0x9   :  { %s407_s21 = scalar_lea.vmem %s17_s13, 256  ;;  %p412_p4 = scmp.lt.s32.totalorder %s17_s13, %s17_s13 }
   0xa   :  { %p408_p3 = scmp.ne.s32.totalorder %s17_s13, %s407_s21  ;;  %p413_p5 = scmp.lt.s32.totalorder %s407_s21, %s407_s21 }
   0xc   :  { %p414_p6 = por %p413_p5, %p412_p4 }
   0xe   :  { %p415_p7 = pnand %p414_p6, %p408_p3 }
  0x10   :  { %418 = shalt.err (!%p415_p7)
}
  0x11   :  { %s470_s22 = smov 128   ;;  %s471_s23 = smov 8  }
  0x12   :  { %22 = dma.hbm_to_vmem [thread:$0]  %s557_s0, 256, %s17_s13, [#allocation3], %s470_s22, %s470_s22, %s471_s23  }
  0x13   :  { %s472_s26 = smov [#allocation5]   ;;  %s419_s30 = scalar_lea.hbm %s558_s1, 2560 }
  0x14   :  { %s28_s27 = sshll.u32 %s472_s26, 4  ;;  %p420_p8 = scmp.ne.s32.totalorder %s558_s1, %s419_s30  ;;  %s29_s27 = int_to_ptr.vmem [resolvable:$true] %s28_s27 }
  0x15   :  { %p423_p9 = scmp.lt.u32.totalorder %s419_s30, %s558_s1 }
  0x17   :  { %p425_p10 = pnand %p423_p9, %p420_p8 }
  0x19   :  { %428 = shalt.err (!%p425_p10)
}
  0x1a   :  { %s429_s8 = scalar_lea.vmem %s29_s27, 2560  ;;  %p434_p12 = scmp.lt.s32.totalorder %s29_s27, %s29_s27 }
  0x1b   :  { %p430_p11 = scmp.ne.s32.totalorder %s29_s27, %s429_s8  ;;  %p435_p13 = scmp.lt.s32.totalorder %s429_s8, %s429_s8 }
  0x1d   :  { %p436_p0 = por %p435_p13, %p434_p12 }
  0x1f   :  { %p437_p1 = pnand %p436_p0, %p430_p11 }
  0x21   :  { %440 = shalt.err (!%p437_p1)
}
  0x22   :  { %34 = dma.hbm_to_vmem [thread:$0]  %s558_s1, 2560, %s29_s27, [#allocation6], %s470_s22, %s470_s22, %s471_s23  }
  0x23   :  { %463 = dma.done.wait [#allocation3], 256  }
  0x24   :  { %464 = vsyncadd [#allocation3], 4294967040 }
  0x25   :  { %465 = dma.done.wait [#allocation6], 2560  }
  0x26   :  { %466 = vsyncadd [#allocation6], 4294964736  ;;  %v356_v0 = vld [vmem:[#allocation5 + $0x4] ss:$8 sps:$4 sm:$0xff]   ;;  %v358_v1 = vld [vmem:[#allocation5] ss:$8 sps:$4 sm:$0xff]   ;;  %v68_v22 = vlaneseq }
  0x27   :  { %191 = vmatprep.subr.bf16.mxu0 %v356_v0  ;;  %v359_v2 = vld [vmem:[#allocation5 + $0x14] ss:$8 sps:$4 sm:$0xff]   ;;  %v361_v3 = vld [vmem:[#allocation5 + $0x10] ss:$8 sps:$4 sm:$0xff]   ;;  %v362_v4 = vld [vmem:[#allocation5 + $0x24] ss:$8 sps:$4 sm:$0xff]  }
  0x28   :  { %192 = vmatpush1.bf16.msra.mxu0 %v358_v1  ;;  %v364_v5 = vld [vmem:[#allocation5 + $0x20] ss:$8 sps:$4 sm:$0xff]   ;;  %v365_v6 = vld [vmem:[#allocation5 + $0x34] ss:$8 sps:$4 sm:$0xff]   ;;  %v367_v7 = vld [vmem:[#allocation5 + $0x30] ss:$8 sps:$4 sm:$0xff]  }
  0x29   :  { %193 = vmatprep.subr.bf16.mxu0 %v359_v2  ;;  %v368_v8 = vld [vmem:[#allocation5 + $0x44] ss:$8 sps:$4 sm:$0xff]   ;;  %vm187_vm0 = vcmask 261120   ;;  %v388_v9 = vld [vmem:[#allocation2 + $0x4] ss:$8 sps:$4 sm:$0xff]   ;;  %v69_v23 = vshrl.u32 %v68_v22, 7 }
  0x2a   :  { %v370_v10 = vld [vmem:[#allocation5 + $0x40] ss:$8 sps:$4 sm:$0xff]   ;;  %v371_v11 = vld [vmem:[#allocation5 + $0x54] ss:$8 sps:$4 sm:$0xff]   ;;  %346 = vmatprep.mubr.msk.bf16.mxu0 %vm187_vm0, %v388_v9  ;;  %v373_v12 = vld [vmem:[#allocation5 + $0x50] ss:$8 sps:$4 sm:$0xff]  }
  0x2b   :  { %v374_v13 = vld [vmem:[#allocation5 + $0x64] ss:$8 sps:$4 sm:$0xff]   ;;  %v376_v14 = vld [vmem:[#allocation5 + $0x60] ss:$8 sps:$4 sm:$0xff]   ;;  %v377_v15 = vld [vmem:[#allocation5 + $0x74] ss:$8 sps:$4 sm:$0xff]  }
  0x2c   :  { %194 = vmatpush1.bf16.msra.mxu0 %v361_v3  ;;  %v379_v16 = vld [vmem:[#allocation5 + $0x70] ss:$8 sps:$4 sm:$0xff]   ;;  %v380_v17 = vld [vmem:[#allocation5 + $0x84] ss:$8 sps:$4 sm:$0xff]   ;;  %v382_v18 = vld [vmem:[#allocation5 + $0x80] ss:$8 sps:$4 sm:$0xff]  }
  0x2d   :  { %195 = vmatprep.subr.bf16.mxu0 %v362_v4  ;;  %v383_v19 = vld [vmem:[#allocation5 + $0x94] ss:$8 sps:$4 sm:$0xff]   ;;  %v385_v20 = vld [vmem:[#allocation5 + $0x90] ss:$8 sps:$4 sm:$0xff]   ;;  %v70_v24 = vsub.s32 0, %v69_v23  ;;  %v74_v26 = vsub.s32 1, %v69_v23 }
  0x2e   :  { %v386_v21 = vld [vmem:[#allocation2] ss:$8 sps:$4 sm:$0xff]   ;;  %v247_v41 = vand.u32 127, %v68_v22  ;;  %s474_s11 = smov 64   ;;  %s475_s12 = smov [#allocation7]  }
  0x2f   :  { %v66_v25 = vld [vmem:[%s559_s2] sm:$0x3]  ;;  %s473_s2 = smov 32   ;;  %s311_s13 = sshll.u32 %s475_s12, 4  ;;  %s312_s13 = int_to_ptr.vmem [resolvable:$true] %s311_s13 }
  0x30   :  { %196 = vmatpush1.bf16.msra.mxu0 %v364_v5  ;;  %v71_v27 = vrot.slane %v66_v25, %v70_v24  ;;  %v75_v28 = vrot.slane %v66_v25, %v74_v26  ;;  %vm248_vm1 = vcmp.lt.s32.totalorder %v247_v41, 32  ;;  %vm265_vm2 = vcmp.lt.s32.totalorder %v247_v41, 64  ;;  %s441_s14 = scalar_lea.vmem %s312_s13, 512  ;;  %p446_p3 = scmp.lt.s32.totalorder %s312_s13, %s312_s13 }
  0x31   :  { %197 = vmatprep.subr.bf16.mxu0 %v365_v6  ;;  %p442_p2 = scmp.ne.s32.totalorder %s312_s13, %s441_s14  ;;  %p447_p4 = scmp.lt.s32.totalorder %s441_s14, %s441_s14 }
  0x33   :  { %p448_p5 = por %p447_p4, %p446_p3 }
  0x34   :  { %198 = vmatpush1.bf16.msra.mxu0 %v367_v7 }
  0x35   :  { %199 = vmatprep.subr.bf16.mxu0 %v368_v8  ;;  %p449_p6 = pnand %p448_p5, %p442_p2 }
  0x38   :  { %200 = vmatpush1.bf16.msra.mxu0 %v370_v10 }
  0x39   :  { %201 = vmatprep.subr.bf16.mxu0 %v371_v11 }
  0x3c   :  { %202 = vmatpush1.bf16.msra.mxu0 %v373_v12 }
  0x3d   :  { %203 = vmatprep.subr.bf16.mxu0 %v374_v13 }
  0x40   :  { %204 = vmatpush1.bf16.msra.mxu0 %v376_v14 }
  0x41   :  { %205 = vmatprep.subr.bf16.mxu0 %v377_v15 }
  0x44   :  { %206 = vmatpush1.bf16.msra.mxu0 %v379_v16 }
  0x45   :  { %207 = vmatprep.subr.bf16.mxu0 %v380_v17 }
  0x48   :  { %208 = vmatpush1.bf16.msra.mxu0 %v382_v18 }
  0x49   :  { %209 = vmatprep.subr.bf16.mxu0 %v383_v19 }
  0x4c   :  { %210 = vmatpush1.bf16.msra.mxu0 %v385_v20 }
  0x4f   :  { %224 = vmatmul.mubr.bf16.vlgmr.msra.gmra.mrb[0].mxu0 %v386_v21 }
 0x122   :  { %v225_v29 = vpop.f32.mrb[0].mxu0 }
 0x123   :  { %v525_v30 = vadd.f32 %v225_v29, %v71_v27  ;;  %v227_v31 = vpop.f32.mrb[1].mxu0 }
 0x124   :  { %v527_v32 = vadd.f32 %v227_v31, %v75_v28  ;;  %v229_v33 = vpop.f32.mrb[2].mxu0 }
 0x125   :  { %v529_v34 = vadd.f32 %v229_v33, %v71_v27  ;;  %v231_v35 = vpop.f32.mrb[3].mxu0  ;;  %v234_v36 = vmul.f32 %v525_v30, %v525_v30 }
 0x126   :  { %v533_v37 = vadd.f32 %v231_v35, %v75_v28  ;;  %v235_v38 = vmul.f32 %v527_v32, %v527_v32 }
 0x127   :  { %238 = vrot.lane.b32.xlu0 %v234_v36, %s473_s2  ;;  %v236_v39 = vmul.f32 %v529_v34, %v529_v34 }
 0x128   :  { %242 = vrot.lane.b32.xlu1 %v235_v38, %s473_s2  ;;  %v237_v40 = vmul.f32 %v533_v37, %v533_v37 }
 0x12b   :  { %240 = vrot.lane.b32.xlu0 %v236_v39, %s473_s2 }
 0x12c   :  { %244 = vrot.lane.b32.xlu1 %v237_v40, %s473_s2 }
 0x199   :  { %v239_v42 = vpop.permute.xlu0 %238 }
 0x19a   :  { %v243_v43 = vpop.permute.xlu1 %242 }
 0x19b   :  { %v251_v44 = vsel %vm248_vm1, %v243_v43, %v239_v42  ;;  %v249_v46 = vsel %vm248_vm1, %v239_v42, %v243_v43 }
 0x19c   :  { %v253_v45 = vadd.f32 %v251_v44, %v234_v36  ;;  %v254_v50 = vadd.f32 %v249_v46, %v235_v38 }
 0x19d   :  { %v241_v47 = vpop.permute.xlu0 %240 }
 0x19e   :  { %v245_v48 = vpop.permute.xlu1 %244  ;;  %257 = vrot.lane.b32.xlu0 %v253_v45, %s474_s11 }
 0x19f   :  { %v252_v49 = vsel %vm248_vm1, %v245_v48, %v241_v47  ;;  %v250_v52 = vsel %vm248_vm1, %v241_v47, %v245_v48 }
 0x1a0   :  { %v255_v51 = vadd.f32 %v252_v49, %v236_v39  ;;  %v256_v53 = vadd.f32 %v250_v52, %v237_v40 }
 0x1a2   :  { %261 = vrot.lane.b32.xlu0 %v254_v50, %s474_s11  ;;  %259 = vrot.lane.b32.xlu1 %v255_v51, %s474_s11 }
 0x1a6   :  { %263 = vrot.lane.b32.xlu1 %v256_v53, %s474_s11 }
 0x210   :  { %v258_v54 = vpop.permute.xlu0 %257 }
 0x214   :  { %v260_v55 = vpop.permute.xlu1 %259  ;;  %v262_v56 = vpop.permute.xlu0 %261 }
 0x215   :  { %v266_v57 = vsel %vm265_vm2, %v258_v54, %v262_v56  ;;  %v268_v58 = vsel %vm265_vm2, %v262_v56, %v258_v54 }
 0x216   :  { %v270_v59 = vadd.f32 %v268_v58, %v253_v45  ;;  %v271_v60 = vadd.f32 %v266_v57, %v254_v50 }
 0x218   :  { %v274_v61 = vadd.f32 %v271_v60, %v270_v59  ;;  %v264_v62 = vpop.permute.xlu1 %263 }
 0x219   :  { %v267_v63 = vsel %vm265_vm2, %v260_v55, %v264_v62  ;;  %v269_v0 = vsel %vm265_vm2, %v264_v62, %v260_v55 }
 0x21a   :  { %389 = vrsqrt.f32 %v274_v61  ;;  %v272_v1 = vadd.f32 %v269_v0, %v255_v51  ;;  %v273_v2 = vadd.f32 %v267_v63, %v256_v53  ;;  %v294_v4 = vadd.f32 1.0, %v274_v61 }
 0x21b   :  { %vm278_vm3 = vcmp.eq.f32.partialorder %v274_v61, inf  ;;  %v281_v8 = vand.u32 2147483648, %v274_v61  ;;  %vm280_vm4 = vcmp.eq.f32.partialorder %v274_v61, 0.0 }
 0x21c   :  { %v275_v3 = vadd.f32 %v273_v2, %v272_v1 }
 0x21e   :  { %391 = vrsqrt.f32 %v275_v3  ;;  %v295_v5 = vadd.f32 1.0, %v275_v3  ;;  %vm285_vm5 = vcmp.eq.f32.partialorder %v275_v3, inf  ;;  %v288_v16 = vand.u32 2147483648, %v275_v3 }
 0x21f   :  { %393 = vrcp.f32 %v294_v4  ;;  %vm287_vm6 = vcmp.eq.f32.partialorder %v275_v3, 0.0 }
 0x220   :  { %395 = vrcp.f32 %v295_v5 }
 0x224   :  { %v390_v6 = vpop.eup %389 }
 0x225   :  { %v277_v7 = vmul.f32 %v390_v6, %v274_v61 }
 0x227   :  { %v279_v9 = vsel %vm278_vm3, %v274_v61, %v277_v7 }
 0x228   :  { %v392_v10 = vpop.eup %391  ;;  %v282_v11 = vsel %vm280_vm4, %v281_v8, %v279_v9 }
 0x229   :  { %v284_v12 = vmul.f32 %v392_v10, %v275_v3  ;;  %v290_v13 = vmul.f32 %v282_v11, %v525_v30  ;;  %v291_v14 = vmul.f32 %v282_v11, %v527_v32  ;;  %v394_v15 = vpop.eup %393 }
 0x22a   :  { %v396_v23 = vpop.eup %395 }
 0x22b   :  { %v286_v17 = vsel %vm285_vm5, %v275_v3, %v284_v12  ;;  %v298_v18 = vmul.f32 %v394_v15, %v290_v13  ;;  %v299_v19 = vmul.f32 %v394_v15, %v291_v14 }
 0x22c   :  { %v289_v20 = vsel %vm287_vm6, %v288_v16, %v286_v17 }
 0x22d   :  { %v292_v21 = vmul.f32 %v289_v20, %v529_v34  ;;  %v293_v22 = vmul.f32 %v289_v20, %v533_v37  ;;  %302 = vst [vmem:[#allocation7] sm:$0xff] %v298_v18  ;;  %303 = vst [vmem:[#allocation7 + $0x8] sm:$0xff] %v299_v19 }
 0x22f   :  { %v300_v24 = vmul.f32 %v396_v23, %v292_v21  ;;  %v301_v25 = vmul.f32 %v396_v23, %v293_v22 }
 0x231   :  { %304 = vst [vmem:[#allocation7 + $0x10] sm:$0xff] %v300_v24  ;;  %305 = vst [vmem:[#allocation7 + $0x18] sm:$0xff] %v301_v25 }
 0x232   :  { %452 = shalt.err (!%p449_p6)
}
 0x233   :  { %s453_s17 = scalar_lea.hbm %s560_s3, 512 }
 0x234   :  { %p454_p7 = scmp.ne.s32.totalorder %s560_s3, %s453_s17  ;;  %p457_p8 = scmp.lt.u32.totalorder %s453_s17, %s560_s3 }
 0x236   :  { %p459_p9 = pnand %p457_p8, %p454_p7 }
 0x238   :  { %462 = shalt.err (!%p459_p9)
}
 0x239   :  { %s476_s22 = smov 256   ;;  %s477_s23 = smov 16  }
 0x23a   :  { %317 = dma.vmem_to_hbm [thread:$0]  %s312_s13, 512, %s560_s3, [#allocation4], %s476_s22, %s476_s22, %s477_s23  }
 0x23b   :  { %467 = dma.done.wait [#allocation4], 512  }
 0x23c   :  { %468 = vsyncadd [#allocation4], 4294966784 }
 0x23d   :  { %321 = vsyncpa [#allocation3], 1 }
 0x23e   :  { %322 = vsyncpa [#allocation6], 1 }
 0x23f   :  { %323 = vsyncpa [#allocation4], 1 }

</bundles_post_ra>
